<compile_context>
chip_gen: v5e
topology: v5e:2x2
jax: 0.10.0
libtpu: 0.0.40
codegen_flags: <defaults>
</compile_context>

<pallas_src>
import jax
import jax.numpy as jnp
from jax.experimental import pallas as pl
from jax.experimental.pallas import tpu as pltpu


def _se_kernel(x_ref, w1t_ref, b1_ref, w2t_ref, b2_ref, o_ref):
    """Fused squeeze-excitation on one block of Nb images, tiles (Nb, C, HW)."""
    x = x_ref[...]                                                    # (Nb, C, HW)

    # --- Squeeze: per-image global average pool, accumulated in f32. ---
    pooled = jnp.mean(x, axis=2, dtype=jnp.float32)                   # (Nb, C)

    # --- Excitation: fc1 -> ReLU -> fc2 -> sigmoid, batched over Nb. ---
    h = jnp.dot(pooled, w1t_ref[...], preferred_element_type=jnp.float32)
    h = jnp.maximum(h + b1_ref[...], 0.0)                             # (Nb, Cr)
    s = jnp.dot(h, w2t_ref[...], preferred_element_type=jnp.float32)
    s = jax.nn.sigmoid(s + b2_ref[...])                               # (Nb, C)

    # --- Scale: broadcast the gate over the spatial (lane) axis. ---
    o_ref[...] = x * s.astype(x.dtype)[:, :, None]


def _pick_batch_block(n, per_image_bytes, target_bytes=4 << 20):
    """Images per grid step: ~target_bytes per block, >=2 steps, divides n."""
    nb = max(1, min(n, int(target_bytes // max(per_image_bytes, 1))))
    if n >= 2:
        # Keep at least 2 grid steps so the parallel batch axis can be split
        # across the two TensorCores on v7x (no effect on v5e / v6e).
        nb = max(1, min(nb, n // 2))
    while n % nb:  # largest divisor of n that is <= nb (trivial index_map)
        nb -= 1
    return nb


def squeeze_excitation(x, w1, b1, w2, b2):
    """x: (N, C, H, W); w1: (Cr, C); b1: (Cr,); w2: (C, Cr); b2: (C,)."""
    N, C, H, W = x.shape
    Cr = w1.shape[0]
    HW = H * W
    itemsize = jnp.dtype(x.dtype).itemsize

    x3 = x.reshape(N, C, HW)                                          # free reshape
    nb = _pick_batch_block(N, C * HW * itemsize)
    grid = (N // nb,)
    block = (nb, C, HW)

    # Pre-transpose weights so both FCs are row-major (Nb, K) @ (K, M) matmuls.
    w1t = jnp.transpose(w1).astype(jnp.float32)                       # (C, Cr)
    w2t = jnp.transpose(w2).astype(jnp.float32)                       # (Cr, C)
    b1r = b1.reshape(1, Cr).astype(jnp.float32)
    b2r = b2.reshape(1, C).astype(jnp.float32)

    # VMEM budget: double-buffered input block + double-buffered output block
    # + small weight/bias tiles, with a little headroom; capped for v7x.
    block_bytes = nb * C * HW * itemsize
    weight_bytes = 4 * (2 * C * Cr + C + Cr)
    vmem_limit = min(64 << 20, max(16 << 20, 4 * block_bytes + weight_bytes + (2 << 20)))

    cost = pl.CostEstimate(
        flops=2 * N * C * HW + 4 * N * C * Cr,
        transcendentals=N * C,
        bytes_accessed=2 * N * C * HW * itemsize + weight_bytes,
    )

    out = pl.pallas_call(
        _se_kernel,
        out_shape=jax.ShapeDtypeStruct(x3.shape, x.dtype),
        grid=grid,
        in_specs=[
            pl.BlockSpec(block, lambda i: (i, 0, 0)),       # x (Nb images)
            pl.BlockSpec((C, Cr), lambda i: (0, 0)),        # fc1 weight^T
            pl.BlockSpec((1, Cr), lambda i: (0, 0)),        # fc1 bias
            pl.BlockSpec((Cr, C), lambda i: (0, 0)),        # fc2 weight^T
            pl.BlockSpec((1, C), lambda i: (0, 0)),         # fc2 bias
        ],
        out_specs=pl.BlockSpec(block, lambda i: (i, 0, 0)),
        compiler_params=pltpu.CompilerParams(
            dimension_semantics=("parallel",),
            vmem_limit_bytes=int(vmem_limit),
        ),
        cost_estimate=cost,
    )(x3, w1t, b1r, w2t, b2r)

    return out.reshape(N, C, H, W)


def _reference(x, w1, b1, w2, b2):
    pooled = x.mean(axis=(2, 3))                                      # (N, C)
    h = jnp.maximum(pooled @ w1.T + b1, 0.0)                          # (N, Cr)
    s = jax.nn.sigmoid(h @ w2.T + b2)                                 # (N, C)
    return x * s[:, :, None, None]


def _run_case(key, N, C, H, W, reduction):
    Cr = max(1, C // reduction)
    kx, kw1, kb1, kw2, kb2 = jax.random.split(key, 5)

    x = jax.random.normal(kx, (N, C, H, W), dtype=jnp.float32)

    # Deterministic PyTorch-Conv2d-style init: U(-1/sqrt(fan_in), 1/sqrt(fan_in)).
    bound1 = 1.0 / jnp.sqrt(jnp.float32(C))
    bound2 = 1.0 / jnp.sqrt(jnp.float32(Cr))
    w1 = jax.random.uniform(kw1, (Cr, C), jnp.float32, -bound1, bound1)
    b1 = jax.random.uniform(kb1, (Cr,), jnp.float32, -bound1, bound1)
    w2 = jax.random.uniform(kw2, (C, Cr), jnp.float32, -bound2, bound2)
    b2 = jax.random.uniform(kb2, (C,), jnp.float32, -bound2, bound2)

    out = jax.block_until_ready(squeeze_excitation(x, w1, b1, w2, b2))
    ref = _reference(x, w1, b1, w2, b2)
    assert out.shape == ref.shape and out.dtype == ref.dtype
    assert jnp.allclose(out, ref, rtol=1e-5, atol=1e-5)


if __name__ == "__main__":
    key = jax.random.PRNGKey(0)
    k1, k2 = jax.random.split(key)

    # Case 1: lane-dense spatial axis (HW = 256 is a multiple of 128); C=32, Cr=2.
    _run_case(k1, N=2, C=32, H=16, W=16, reduction=16)

    # Case 2: ragged spatial axis (HW = 49) with C = 128, Cr = 8 (masked stores).
    _run_case(k2, N=2, C=128, H=7, W=7, reduction=16)

    print("KERNEL_OK")
</pallas_src>

<mosaic_0001>
module attributes {stable_mosaic.version = 11 : i64} {
  func.func @_se_kernel(%arg0: i32, %arg1: memref<1x32x256xf32, #tpu.memory_space<vmem>>, %arg2: memref<32x2xf32, #tpu.memory_space<vmem>>, %arg3: memref<1x2xf32, #tpu.memory_space<vmem>>, %arg4: memref<2x32xf32, #tpu.memory_space<vmem>>, %arg5: memref<1x32xf32, #tpu.memory_space<vmem>>, %arg6: memref<1x32x256xf32, #tpu.memory_space<vmem>>) attributes {dimension_semantics = [#tpu.dimension_semantics<parallel>], iteration_bounds = array<i64: 2>, scalar_prefetch = 0 : i64, scratch_operands = 0 : i64, tpu.core_type = #tpu.core_type<tc>, window_params = [{transform_indices = @transform_0, window_bounds = array<i64: 1, 32, 256>}, {pipeline_mode = #tpu.pipeline_mode<synchronous>, transform_indices = @transform_1, window_bounds = array<i64: 32, 2>}, {pipeline_mode = #tpu.pipeline_mode<synchronous>, transform_indices = @transform_2, window_bounds = array<i64: 1, 2>}, {pipeline_mode = #tpu.pipeline_mode<synchronous>, transform_indices = @transform_3, window_bounds = array<i64: 2, 32>}, {pipeline_mode = #tpu.pipeline_mode<synchronous>, transform_indices = @transform_4, window_bounds = array<i64: 1, 32>}, {transform_indices = @transform_5, window_bounds = array<i64: 1, 32, 256>}]} {
    %c0 = arith.constant 0 : index
    %c0_0 = arith.constant 0 : index
    %c0_1 = arith.constant 0 : index
    %0 = vector.load %arg1[%c0, %c0_0, %c0_1] : memref<1x32x256xf32, #tpu.memory_space<vmem>>, vector<1x32x256xf32>
    %cst = arith.constant dense<0.000000e+00> : vector<1x32xf32>
    %1 = vector.multi_reduction <add>, %0, %cst [2] : vector<1x32x256xf32> to vector<1x32xf32>
    %cst_2 = arith.constant 2.560000e+02 : f32
    %2 = vector.broadcast %cst_2 : f32 to vector<1x32xf32>
    %3 = arith.divf %1, %2 : vector<1x32xf32>
    %c0_3 = arith.constant 0 : index
    %c0_4 = arith.constant 0 : index
    %4 = vector.load %arg2[%c0_3, %c0_4] : memref<32x2xf32, #tpu.memory_space<vmem>>, vector<32x2xf32>
    %cst_5 = arith.constant dense<0.000000e+00> : vector<1x2xf32>
    %5 = tpu.matmul %3, %4, %cst_5 {dimension_numbers = #tpu.dot_dimension_numbers<[1], [0], [0], [1], [0, 0, 1, 1], [], []>} : vector<1x32xf32>, vector<32x2xf32>, vector<1x2xf32> -> vector<1x2xf32>
    %c0_6 = arith.constant 0 : index
    %c0_7 = arith.constant 0 : index
    %6 = vector.load %arg3[%c0_6, %c0_7] : memref<1x2xf32, #tpu.memory_space<vmem>>, vector<1x2xf32>
    %7 = arith.addf %5, %6 : vector<1x2xf32>
    %cst_8 = arith.constant 0.000000e+00 : f32
    %8 = vector.broadcast %cst_8 : f32 to vector<1x2xf32>
    %9 = arith.maximumf %7, %8 : vector<1x2xf32>
    %c0_9 = arith.constant 0 : index
    %c0_10 = arith.constant 0 : index
    %10 = vector.load %arg4[%c0_9, %c0_10] : memref<2x32xf32, #tpu.memory_space<vmem>>, vector<2x32xf32>
    %cst_11 = arith.constant dense<0.000000e+00> : vector<1x32xf32>
    %11 = tpu.matmul %9, %10, %cst_11 {dimension_numbers = #tpu.dot_dimension_numbers<[1], [0], [0], [1], [0, 0, 1, 1], [], []>} : vector<1x2xf32>, vector<2x32xf32>, vector<1x32xf32> -> vector<1x32xf32>
    %c0_12 = arith.constant 0 : index
    %c0_13 = arith.constant 0 : index
    %12 = vector.load %arg5[%c0_12, %c0_13] : memref<1x32xf32, #tpu.memory_space<vmem>>, vector<1x32xf32>
    %13 = arith.addf %11, %12 : vector<1x32xf32>
    %14 = arith.negf %13 : vector<1x32xf32>
    %15 = math.exp %14 : vector<1x32xf32>
    %cst_14 = arith.constant 1.000000e+00 : f32
    %16 = vector.broadcast %cst_14 : f32 to vector<1x32xf32>
    %17 = arith.addf %16, %15 : vector<1x32xf32>
    %18 = arith.divf %16, %17 : vector<1x32xf32>
    %19 = vector.shape_cast %18 : vector<1x32xf32> to vector<1x32x1xf32>
    %20 = vector.broadcast %19 : vector<1x32x1xf32> to vector<1x32x256xf32>
    %21 = arith.mulf %0, %20 : vector<1x32x256xf32>
    %c0_15 = arith.constant 0 : index
    %c0_16 = arith.constant 0 : index
    %c0_17 = arith.constant 0 : index
    %22 = vector.load %arg6[%c0_15, %c0_16, %c0_17] : memref<1x32x256xf32, #tpu.memory_space<vmem>>, vector<1x32x256xf32>
    tpu.vector_store %arg6[%c0_15, %c0_16, %c0_17], %21 {strides = array<i32>} : memref<1x32x256xf32, #tpu.memory_space<vmem>>, vector<1x32x256xf32>,
    return
  }
  func.func @transform_0(%arg0: i32) -> (i32, i32, i32) {
    %c0_i32 = arith.constant 0 : i32
    %c0_i32_0 = arith.constant 0 : i32
    %c0_i32_1 = arith.constant 0 : i32
    return %arg0, %c0_i32, %c0_i32_0 : i32, i32, i32
  }
  func.func @transform_1(%arg0: i32) -> (i32, i32) {
    %c0_i32 = arith.constant 0 : i32
    %c0_i32_0 = arith.constant 0 : i32
    %c0_i32_1 = arith.constant 0 : i32
    return %c0_i32, %c0_i32_0 : i32, i32
  }
  func.func @transform_2(%arg0: i32) -> (i32, i32) {
    %c0_i32 = arith.constant 0 : i32
    %c0_i32_0 = arith.constant 0 : i32
    %c0_i32_1 = arith.constant 0 : i32
    return %c0_i32, %c0_i32_0 : i32, i32
  }
  func.func @transform_3(%arg0: i32) -> (i32, i32) {
    %c0_i32 = arith.constant 0 : i32
    %c0_i32_0 = arith.constant 0 : i32
    %c0_i32_1 = arith.constant 0 : i32
    return %c0_i32, %c0_i32_0 : i32, i32
  }
  func.func @transform_4(%arg0: i32) -> (i32, i32) {
    %c0_i32 = arith.constant 0 : i32
    %c0_i32_0 = arith.constant 0 : i32
    %c0_i32_1 = arith.constant 0 : i32
    return %c0_i32, %c0_i32_0 : i32, i32
  }
  func.func @transform_5(%arg0: i32) -> (i32, i32, i32) {
    %c0_i32 = arith.constant 0 : i32
    %c0_i32_0 = arith.constant 0 : i32
    %c0_i32_1 = arith.constant 0 : i32
    return %arg0, %c0_i32, %c0_i32_0 : i32, i32, i32
  }
}

</mosaic_0001>

<bundles_post_ra>
// kernel: tpu_custom_call.1
= control target key start
LH: loop header
LB: loop body
LE: loop exit
PB: predicated region body
PF: predicated region fallthrough
CT: control target
= control target key end

     0   :  { %10 = vsyncpa [#allocation3], 0  ;;  %s902_s0 = inlined_call_operand.hbm [shape: f32[2,32,256], index: 0, kind: input, shape index: {}]   ;;  %s903_s1 = inlined_call_operand.vmem [shape: f32[32,2], index: 1, kind: input, shape index: {}]   ;;  %s904_s2 = inlined_call_operand.vmem [shape: f32[1,2], index: 2, kind: input, shape index: {}]   ;;  %s905_s3 = inlined_call_operand.vmem [shape: f32[2,32], index: 3, kind: input, shape index: {}]   ;;  %s906_s4 = inlined_call_operand.vmem [shape: f32[1,32], index: 4, kind: input, shape index: {}]   ;;  %s907_s5 = inlined_call_operand.hbm [shape: f32[2,32,256], index: 5, kind: output, shape index: {}]  }
   0x1   :  { %12 = vsyncpa [#allocation3 + $0x1], 0 }
   0x2   :  { %13 = vsyncpa [#allocation4], 0 }
   0x3   :  { %15 = vsyncpa [#allocation4 + $0x1], 0  ;;  %s718_s18 = smov 0   ;;  %s720_s19 = smov 0  }
   0x4   :  { %s722_s20 = smov 0   ;;  %s724_s21 = smov 0  }
   0x5 LB: > { %s739_s22 = sadd.s32 4294967295, %s681_s21   ;;  %s503_s23 = sadd.s32 4294967294, %s681_s21   ;;  %s681_s21 = sphi %s724_s21, %s917_s21   ;;  %s677_s20 = sphi %s722_s20, %s916_s20   ;;  %s673_s19 = sphi %s720_s19, %s915_s19   ;;  %s669_s18 = sphi %s718_s18, %s914_s18  }
   0x6   : > { %s743_s24 = sadd.s32 1, %s681_s21   ;;  %s28_s25 = sadd.s32 1, %s677_s20 }
   0x7   : > { %s25_s26 = ssub.s32 %s681_s21, %s743_s24  ;;  %p35_p0 = scmp.ne.s32.totalorder %s677_s20, %s673_s19 }
   0x8   : > { %p26_p1 = scmp.eq.s32.totalorder %s25_s26, 0  ;;  %p36_p2 = scmp.eq.s32.totalorder %s681_s21, 0 }
   0x9   : > { %p41_p3 = scmp.ne.s32.totalorder %s673_s19, %s669_s18  ;;  %p42_p4 = scmp.eq.s32.totalorder %s739_s22, 0 }
   0xa   : > { %s755_s27 = scalar_select %p26_p1, %s677_s20, %s28_s25  }
   0xb   : > { %p757_p5 = por %p36_p2, %p35_p0  ;;  %p761_p6 = por %p42_p4, %p41_p3 }
   0xc   : > { %p149_p7 = scmp.eq.s32.totalorder %s739_s22, 1  ;;  %p155_p8 = scmp.eq.s32.totalorder %s503_s23, 1 }
   0xd   : > { %p535_p10 = scmp.lt.s32.totalorder %s681_s21, 2  ;;  %s187_s7 = sand.u32 1, %s677_s20  }
   0xe   : > { %p768_p11 = por %p149_p7, %p35_p0  ;;  %p772_p12 = por %p155_p8, %p41_p3 }
   0xf   : > { %s521_s8 = sshll.u32 %s681_s21, 6  ;;  %s506_s9 = sshll.u32 %s187_s7, 6 }
  0x10   : > { %s196_s12 = scalar_lea.hbm %s902_s0, %s521_s8  ;;  %s191_s14 = scalar_lea.vmem [#allocation2], %s506_s9 }
  0x11   : > { %s197_s13 = sshll.u32 %s196_s12, 4  ;;  %s199_s15 = sshll.u32 %s191_s14, 4  ;;  %s198_s13 = int_to_ptr.hbm [resolvable:$true] %s197_s13  ;;  %s200_s15 = int_to_ptr.vmem [resolvable:$true] %s199_s15 }
  0x12   : > { %p783_p13 = pnand %p535_p10, %p757_p5  ;;  %p509_p0 = scmp.ge.s32.totalorder %s681_s21, 1 }
  0x13   : > { %p207_p1 = scmp.lt.s32.totalorder %s681_s21, 3  ;;  %s188_s17 = scalar_lea.sflag [#allocation3], %s187_s7 }
  0x14   : > { %s585_s23 = sshra.s32 %s198_s13, 4  ;;  %p589_p3 = pneg %p783_p13  ;;  %s586_s23 = int_to_ptr.hbm [resolvable:$true] %s585_s23 }
  0x15   : > { %s587_s25 = scalar_lea.hbm %s586_s23, 64  ;;  %s592_s28 = scalar_lea.hbm %s902_s0, 128 }
  0x16   : > { %p588_p2 = scmp.ne.s32.totalorder %s586_s23, %s587_s25  ;;  %p593_p5 = scmp.lt.s32.totalorder %s586_s23, %s902_s0 }
  0x17   : > { %p594_p8 = scmp.lt.s32.totalorder %s592_s28, %s587_s25 }
  0x18   : > { %p590_p4 = pnand %p589_p3, %p588_p2 }
  0x19   : > { %p595_p10 = por %p594_p8, %p593_p5 }
  0x1a   : > { %p591_p7 = pneg %p590_p4 }
  0x1c   : > { %p596_p9 = pnand %p595_p10, %p591_p7 }
  0x1e   : > { %599 = shalt.err (!%p596_p9)
}
  0x1f   : > { %s683_s7 = smov 256   ;;  %s684_s11 = smov 16  }
  0x20   : > { %530 = dma.hbm_to_vmem [thread:$0]  (!%p783_p13), %s198_s13, 1024, %s200_s15, %s188_s17, %s683_s7, %s683_s7, %s684_s11  }
  0x21   : > { %p208_p2 = pnand %p509_p0, %p207_p1 }
  0x22   : > { %s804_s12 = sand.u32 (!%p208_p2), 1, %s673_s19  }
  0x23   : > { %211 = sbr.rel (%p208_p2) target bundleno = 587 (0x24b), region = 40  ;;  %s510_s14 = sshll.u32 (!%p208_p2), %s804_s12, 6 }
  0x24   : > { %s214_s23 = scalar_lea.sflag (!%p208_p2), [#allocation3], %s804_s12  ;;  %s217_s25 = scalar_lea.vmem (!%p208_p2), [#allocation2], %s510_s14 }
  0x28   : > { %660 = dma.done.wait (%p761_p6), %s214_s23, 1024  }
  0x29   : > { %662 = vsyncadd (%p761_p6), %s214_s23, 4294966272  ;;  %v814_v0 = vld [vmem:[%s217_s25] sm:$0xff]  ;;  %v816_v1 = vld [vmem:[%s217_s25 + $0x8] sm:$0xff]  ;;  %v685_v14 = vmov 256.0   ;;  %v285_v22 = vlaneseq  ;;  %vm290_vm1 = vcmask 130112   ;;  %vm294_vm2 = vcmask 195712  }
  0x2a   : > { %v818_v2 = vld [vmem:[%s217_s25 + $0x20] sm:$0xff]  ;;  %v253_v3 = vadd.f32 %v816_v1, %v814_v0  ;;  %v822_v4 = vld [vmem:[%s217_s25 + $0x28] sm:$0xff]  ;;  %v826_v6 = vld [vmem:[%s217_s25 + $0x10] sm:$0xff]  ;;  %579 = vrcp.f32 %v685_v14  ;;  %vm298_vm3 = vcmask 261312   ;;  %vm300_vm4 = vcmask 261120   ;;  %s244_s29 = scalar_lea.vmem [#allocation5], %s510_s14 }
  0x2b   : > { %v259_v5 = vadd.f32 %v822_v4, %v818_v2  ;;  %v828_v7 = vld [vmem:[%s217_s25 + $0x18] sm:$0xff]  ;;  %v830_v8 = vld [vmem:[%s217_s25 + $0x30] sm:$0xff]  ;;  %v277_v15 = vld [vmem:[%s903_s1 + $0x8] sm:$0xff]  ;;  %v286_v26 = vand.u32 127, %v285_v22  ;;  %vm330_vm5 = vcmask 1041408   ;;  %vm326_vm6 = vcmask 15360  }
  0x2c   : > { %254 = vadd.xlane.f32.xlu0 %v253_v3  ;;  %v832_v9 = vld [vmem:[%s217_s25 + $0x38] sm:$0xff]  ;;  %v256_v10 = vadd.f32 %v828_v7, %v826_v6  ;;  %v278_v13 = vld [vmem:[%s903_s1 + $0x10] sm:$0xff]  ;;  %v276_v16 = vld [vmem:[%s903_s1] sm:$0xff]  ;;  %v375_v48 = vshrl.u32 %v285_v22, 7  ;;  %s522_s13 = sshll.u32 %s739_s22, 6  ;;  %s427_s26 = sshll.u32 %s244_s29, 4  ;;  %s428_s26 = int_to_ptr.vmem [resolvable:$true] %s427_s26 }
  0x2d   : > { %260 = vadd.xlane.f32.xlu1 %v259_v5  ;;  %v262_v11 = vadd.f32 %v832_v9, %v830_v8  ;;  %v279_v12 = vld [vmem:[%s903_s1 + $0x18] sm:$0xff]  ;;  %v288_v28 = vadd.s32 4294967288, %v286_v26  ;;  %v292_v29 = vadd.s32 4294967280, %v286_v26  ;;  %v296_v32 = vadd.s32 4294967272, %v286_v26  ;;  %v324_v43 = vld [vmem:[%s905_s3] sm:$0x3]  ;;  %s426_s17 = scalar_lea.hbm %s907_s5, %s522_s13 }
  0x2e   : > { %315 = vmatpush.msra.mxu0 %v279_v12  ;;  %513 = vmatpush.msk.msra.mxu1 %vm330_vm5, %v324_v43  ;;  %v280_v44 = vld [vmem:[%s904_s2] sm:$0x1]  ;;  %v394_v49 = vadd.s32 24, %v375_v48  ;;  %v388_v50 = vadd.s32 16, %v375_v48  ;;  %v382_v12 = vadd.s32 8, %v375_v48  ;;  %s429_s8 = sshll.u32 %s426_s17, 4  ;;  %s430_s8 = int_to_ptr.hbm [resolvable:$true] %s429_s8 }
  0x2f   : > { %574 = vset.pattern.permute.xlu2 %v375_v48  ;;  %v325_v51 = vld [vmem:[%s906_s4] sm:$0x1]  ;;  %s415_s22 = scalar_lea.sflag [#allocation4], %s804_s12  ;;  %s629_s14 = sshra.s32 %s430_s8, 4  ;;  %s630_s14 = int_to_ptr.hbm [resolvable:$true] %s629_s14 }
  0x30   : > { %316 = vmatpush.msra.mxu0 %v278_v13  ;;  %v580_v17 = vpop.eup %579  ;;  %577 = vset.pattern.permute.xlu1 %v394_v49  ;;  %s631_s28 = scalar_lea.hbm %s630_s14, 64  ;;  %s635_s7 = scalar_lea.hbm %s907_s5, 128 }
  0x31   : > { %v266_v18 = vmul.f32 256.0, %v580_v17  ;;  %vm270_vm0 = vweird.f32 %v580_v17  ;;  %576 = vset.pattern.permute.xlu0 %v388_v50  ;;  %p632_p6 = scmp.ne.s32.totalorder %s630_s14, %s631_s28  ;;  %p636_p0 = scmp.lt.s32.totalorder %s630_s14, %s907_s5 }
  0x32   : > { %317 = vmatpush.msra.mxu0 %v277_v15  ;;  %p637_p1 = scmp.lt.s32.totalorder %s635_s7, %s631_s28 }
  0x33   : > { %v267_v19 = vsub.f32 1.0, %v266_v18  ;;  %p633_p9 = pnand %p632_p6, %p768_p11 }
  0x34   : > { %257 = vadd.xlane.f32.xlu0 %v256_v10  ;;  %318 = vmatpush.msra.mxu0 %v276_v16  ;;  %p638_p3 = por %p637_p1, %p636_p0 }
  0x35   : > { %263 = vadd.xlane.f32.xlu1 %v262_v11  ;;  %v268_v20 = vmul.f32 %v580_v17, %v267_v19  ;;  %p634_p13 = pneg %p633_p9 }
  0x37   : > { %v269_v21 = vadd.f32 %v580_v17, %v268_v20  ;;  %p639_p4 = pnand %p638_p3, %p634_p13 }
  0x39   : > { %v271_v25 = vsel %vm270_vm0, %v580_v17, %v269_v21 }
  0x9f   : > { %v255_v23 = vpop.xlane.xlu0 %254 }
  0xa0   : > { %v261_v24 = vpop.xlane.xlu1 %260  ;;  %v272_v27 = vmul.f32 %v271_v25, %v255_v23 }
  0xa1   : > { %v274_v30 = vmul.f32 %v271_v25, %v261_v24 }
  0xa2   : > { %v287_v36 = vperm.slane %v272_v27, %v286_v26 }
  0xa3   : > { %v293_v38 = vperm.slane %v274_v30, %v292_v29 }
  0xa7   : > { %v258_v31 = vpop.xlane.xlu0 %257 }
  0xa8   : > { %v273_v33 = vmul.f32 %v271_v25, %v258_v31  ;;  %v264_v34 = vpop.xlane.xlu1 %263 }
  0xa9   : > { %v275_v35 = vmul.f32 %v271_v25, %v264_v34 }
  0xaa   : > { %v289_v37 = vperm.slane %v273_v33, %v288_v28 }
  0xab   : > { %v297_v39 = vperm.slane %v275_v35, %v296_v32 }
  0xac   : > { %v291_v40 = vsel %vm290_vm1, %v289_v37, %v287_v36 }
  0xad   : > { %v295_v41 = vsel %vm294_vm2, %v293_v38, %v291_v40 }
  0xae   : > { %v299_v42 = vsel %vm298_vm3, %v297_v39, %v295_v41 }
  0xaf   : > { %512 = vmatmul.msk.f32.vlgmr.msra.gmra.mxu0 %vm300_vm4, %v299_v42 }
 0x12c   : > { %v320_v45 = vpop.f32.mrf.mxu0 }
 0x12d   : > { %v321_v46 = vadd.f32 %v320_v45, %v280_v44 }
 0x12f   : > { %v323_v47 = vmax.f32 %v321_v46, 0.0 }
 0x131   : > { %514 = vmatmul.msk.f32.vlgmr.msra.gmra.mxu1 %vm326_vm6, %v323_v47 }
 0x1ae   : > { %v351_v52 = vpop.f32.mrf.mxu1 }
 0x1af   : > { %v352_v53 = vadd.f32 %v351_v52, %v325_v51 }
 0x1b1   : > { %v515_v54 = vmul.f32 -1.442695, %v352_v53 }
 0x1b3   : > { %581 = vpow2.f32 %v515_v54 }
 0x1b9   : > { %v582_v55 = vpop.eup %581 }
 0x1ba   : > { %v357_v56 = vadd.f32 1.0, %v582_v55 }
 0x1bc   : > { %583 = vrcp.f32 %v357_v56  ;;  %v369_v60 = vand.u32 2147483648, %v357_v56  ;;  %v367_v62 = vand.u32 2147483647, %v357_v56  ;;  %vm363_vm8 = vweird.f32 %v357_v56 }
 0x1be   : > { %v370_v3 = vor.u32 1.1754944e-38, %v369_v60  ;;  %vm368_vm10 = vcmp.eq.f32.partialorder %v367_v62, 8.507059e+37 }
 0x1c2   : > { %v584_v57 = vpop.eup %583 }
 0x1c3   : > { %v359_v58 = vmul.f32 %v584_v57, %v357_v56  ;;  %vm364_vm7 = vweird.f32 %v584_v57 }
 0x1c4   : > { %vm365_vm9 = vmor %vm363_vm8, %vm364_vm7 }
 0x1c5   : > { %v360_v59 = vsub.f32 1.0, %v359_v58 }
 0x1c7   : > { %v361_v61 = vmul.f32 %v584_v57, %v360_v59 }
 0x1c9   : > { %v362_v63 = vadd.f32 %v584_v57, %v361_v61 }
 0x1cb   : > { %v366_v5 = vsel %vm365_vm9, %v584_v57, %v362_v63 }
 0x1cc   : > { %v371_v10 = vsel %vm368_vm10, %v370_v3, %v366_v5 }
 0x1cd   : > { %v373_v11 = vperm.slane %v371_v10, 0 }
 0x1cf   : > { %396 = vperm.xlu1 %577, %v373_v11   ;;  %390 = vperm.xlu0 %576, %v373_v11  }
 0x1d0   : > { %378 = vperm.xlu2 %574, %v373_v11  }
 0x1d7   : > { %578 = vset.pattern.permute.xlu0 %v394_v49 }
 0x1d8   : > { %575 = vset.pattern.permute.xlu2 %v382_v12 }
 0x1e0   : > { %384 = vperm.xlu2 %575, %v373_v11  }
 0x22a   : > { %v379_v13 = vpop.permute.xlu2 %378 }
 0x22b   : > { %v398_v14 = vmul.f32 %v379_v13, %v814_v0  ;;  %v399_v15 = vmul.f32 %v379_v13, %v816_v1 }
 0x22d   : > { %406 = vst [vmem:[%s244_s29] sm:$0xff] %v398_v14 }
 0x22e   : > { %407 = vst [vmem:[%s244_s29 + $0x8] sm:$0xff] %v399_v15 }
 0x23a   : > { %v385_v16 = vpop.permute.xlu2 %384 }
 0x23b   : > { %v400_v17 = vmul.f32 %v385_v16, %v826_v6  ;;  %v401_v18 = vmul.f32 %v385_v16, %v828_v7 }
 0x23d   : > { %408 = vst [vmem:[%s244_s29 + $0x10] sm:$0xff] %v400_v17 }
 0x23e   : > { %409 = vst [vmem:[%s244_s29 + $0x18] sm:$0xff] %v401_v18 }
 0x241   : > { %v397_v0 = vpop.permute.xlu1 %396  ;;  %v391_v1 = vpop.permute.xlu0 %390 }
 0x242   : > { %v404_v19 = vmul.f32 %v397_v0, %v830_v8  ;;  %v405_v20 = vmul.f32 %v397_v0, %v832_v9  ;;  %v402_v6 = vmul.f32 %v391_v1, %v818_v2  ;;  %v403_v7 = vmul.f32 %v391_v1, %v822_v4 }
 0x244   : > { %412 = vst [vmem:[%s244_s29 + $0x30] sm:$0xff] %v404_v19 }
 0x245   : > { %413 = vst [vmem:[%s244_s29 + $0x38] sm:$0xff] %v405_v20 }
 0x246   : > { %410 = vst [vmem:[%s244_s29 + $0x20] sm:$0xff] %v402_v6 }
 0x247   : > { %411 = vst [vmem:[%s244_s29 + $0x28] sm:$0xff] %v403_v7 }
 0x248   : > { %642 = shalt.err (!%p639_p4)
}
 0x249   : > { %s686_s12 = smov 256   ;;  %s687_s25 = smov 16  }
 0x24a   : > { %525 = dma.vmem_to_hbm [thread:$0]  (%p768_p11), %s428_s26, 1024, %s430_s8, %s415_s22, %s686_s12, %s686_s12, %s687_s25  }
 0x24b PF: > { %s444_s29 = sand.u32 1, %s669_s18   ;;  %p913_p7 = scmp.ge.s32.totalorder %s681_s21, 2 }
 0x24c   : > { %s445_s13 = scalar_lea.sflag [#allocation4], %s444_s29 }
 0x24d   : > { %p532_p5 = pnand %p913_p7, %p772_p12 }
 0x24f   : > { %p533_p8 = pneg %p532_p5 }
 0x251   : > { %664 = dma.done.wait (%p533_p8), %s445_s13, 1024  }
 0x252   : > { %666 = vsyncadd (%p533_p8), %s445_s13, 4294966272  ;;  %p18_p10 = scmp.ge.s32.totalorder %s743_s24, 4   ;;  %s914_s18 = smov %s673_s19 }
 0x253   : > { %s915_s19 = smov %s677_s20  ;;  %s916_s20 = smov %s755_s27 }
 0x254   : > { %s917_s21 = smov %s743_s24  ;;  %20 = sbr.rel (!%p18_p10) target bundleno = 5 (0x5), region = 85 }
 0x259   :  { %451 = vsyncpa [#allocation3], 1 }
 0x25a   :  { %453 = vsyncpa [#allocation3 + $0x1], 1 }
 0x25b   :  { %454 = vsyncpa [#allocation4], 1 }
 0x25c   :  { %456 = vsyncpa [#allocation4 + $0x1], 1 }

</bundles_post_ra>
